<compile_context>
chip_gen: v6e
topology: v6e:2x2x1
jax: 0.10.0
libtpu: 0.0.40
codegen_flags: <defaults>
</compile_context>

<pallas_src>
import math

import jax
import jax.numpy as jnp
from jax.experimental import pallas as pl
from jax.experimental.pallas import tpu as pltpu

# ----------------------------- config -------------------------------------
B = 2           # batch
S = 8           # sequence length
H = 32          # hidden_size
NH = 4          # num attention heads
HD = H // NH    # head dim
I = 64          # FFN intermediate size
EPS = 1e-6      # nn.LayerNorm(hidden_size, eps=1e-06) in the reference Encoder
NEG_INF = -1e30

G = B * NH * S  # expanded (batch, head, query) rows = 64
N = B * S       # flattened (batch, token) rows      = 16

# rows of the packed per-channel parameter buffer ([6, H])
ROW_N1W, ROW_N1B, ROW_N2W, ROW_N2B, ROW_BO, ROW_B2 = range(6)


def _layernorm(v, w, b):
    mu = jnp.mean(v, axis=-1, keepdims=True)
    var = jnp.mean((v - mu) ** 2, axis=-1, keepdims=True)
    return (v - mu) * jax.lax.rsqrt(var + EPS) * w + b


def encoder_kernel(x_ref, bias_ref, hsel_ref, expand_ref, fold_ref,
                   wqkv_ref, bqkv_ref, wo_ref, vec_ref,
                   w1_ref, b1_ref, w2_ref, o_ref):
    # Whole batch in one invocation: x is the flattened [N, H] hidden state.
    x = x_ref[...]                                              # [16, 32]
    vecs = vec_ref[...]                                         # [6, 32]

    # ---- norm1 (pre-norm) ----
    xn = _layernorm(x, vecs[ROW_N1W:ROW_N1W + 1, :], vecs[ROW_N1B:ROW_N1B + 1, :])

    # ---- fused QKV projection: one MXU pass over [N, 3H] ----
    qkv = jnp.dot(xn, wqkv_ref[...], preferred_element_type=jnp.float32) + bqkv_ref[...]
    q = qkv[:, 0 * H:1 * H]                                     # [16, 32]
    k = qkv[:, 1 * H:2 * H]
    v = qkv[:, 2 * H:3 * H]

    # ---- batched multi-head self attention (no per-head python loop) ----
    # Expanded rows r = b*NH*S + h*S + i.  expand_mat replicates each token's
    # query once per head (MXU), hsel keeps only head h's HD lanes, so one
    # [G,H]x[H,N] matmul produces every head's scores at once.
    hsel = hsel_ref[...]                                        # [64, 32] 0/1 selector
    q_rep = jnp.dot(expand_ref[...], q,
                    preferred_element_type=jnp.float32)         # [64, 32]
    q_masked = q_rep * hsel

    scale = 1.0 / math.sqrt(HD)
    scores = jax.lax.dot_general(                               # q_masked @ k.T
        q_masked, k, (((1,), (1,)), ((), ())),
        preferred_element_type=jnp.float32) * scale             # [64, 16]

    # relative position bias tiled over batch + cross-batch -inf mask,
    # precomputed in the wrapper as one additive slab.
    # TODO(synk): optional attention `mask` argument (None in this path) not plumbed through.
    scores = scores + bias_ref[...]

    scores = scores - jnp.max(scores, axis=-1, keepdims=True)
    p = jnp.exp(scores)
    p = p * pl.reciprocal(jnp.sum(p, axis=-1, keepdims=True), approx=True)

    ctx = jnp.dot(p, v, preferred_element_type=jnp.float32) * hsel      # [64, 32]
    # fold heads back into the lane dim (head h owns lanes h*HD:(h+1)*HD)
    attn = jnp.dot(fold_ref[...], ctx, preferred_element_type=jnp.float32)  # [16, 32]

    attn = jnp.dot(attn, wo_ref[...], preferred_element_type=jnp.float32) \
        + vecs[ROW_BO:ROW_BO + 1, :]

    # dropout1 -> identity (eval); residual
    h1 = x + attn

    # ---- norm2 + feed forward ----
    h1n = _layernorm(h1, vecs[ROW_N2W:ROW_N2W + 1, :], vecs[ROW_N2B:ROW_N2B + 1, :])
    ff = jnp.dot(h1n, w1_ref[...], preferred_element_type=jnp.float32) + b1_ref[...]
    # TODO(synk): FeedForward impl isn't given in the spec; tanh-GELU assumed
    # (swap to erf GELU if the reference uses nn.GELU() exact form).
    ff = jax.nn.gelu(ff, approximate=True)
    ff = jnp.dot(ff, w2_ref[...], preferred_element_type=jnp.float32) \
        + vecs[ROW_B2:ROW_B2 + 1, :]

    # dropout2 / dropout_ffn -> identity (eval); residual
    o_ref[...] = h1 + ff                                        # single slab store


# ----------------------- wrapper-side layout plumbing ----------------------
def _head_selector():
    g = jnp.arange(G)[:, None]
    lane = jnp.arange(H)[None, :]
    return (((g // S) % NH) == (lane // HD)).astype(jnp.float32)        # [G, H]


def _expand_fold_mats():
    g = jnp.arange(G)
    n_of_g = (g // (NH * S)) * S + (g % S)                              # b*S + i
    expand = (n_of_g[:, None] == jnp.arange(N)[None, :]).astype(jnp.float32)  # [G, N]
    return expand, expand.T                                             # fold: [N, G]


def _bias_slab(biases):
    """[NH,S,S] rel-pos bias -> [G,N] additive slab incl. cross-batch -inf."""
    bias2 = biases.reshape(NH * S, S)                                    # [32, 8]
    bias_full = jnp.tile(bias2, (B, B))                                  # [64, 16]
    g = jnp.arange(G)[:, None]
    n = jnp.arange(N)[None, :]
    same_batch = (g // (NH * S)) == (n // S)
    return jnp.where(same_batch, bias_full, NEG_INF).astype(jnp.float32)


@jax.jit
def encoder_forward(x, biases, params):
    """x: [B, S, H] float32, biases: [NH, S, S] float32."""
    wqkv, bqkv, wo, vecs, w1, b1, w2 = params
    x_flat = x.reshape(N, H)                 # single lane-dense slab for the kernel
    bias_slab = _bias_slab(biases)
    hsel = _head_selector()
    expand_mat, fold_mat = _expand_fold_mats()

    inputs = (x_flat, bias_slab, hsel, expand_mat, fold_mat,
              wqkv, bqkv, wo, vecs, w1, b1, w2)

    out = pl.pallas_call(
        encoder_kernel,
        out_shape=jax.ShapeDtypeStruct((N, H), jnp.float32),
        in_specs=[pl.BlockSpec(memory_space=pltpu.MemorySpace.VMEM)
                  for _ in inputs],
        out_specs=pl.BlockSpec(memory_space=pltpu.MemorySpace.VMEM),
    )(*inputs)
    return out.reshape(B, S, H)


# --------------------------- params / reference -----------------------------
def init_params(key):
    ks = jax.random.split(key, 6)
    std = 0.02
    wq = jax.random.normal(ks[0], (H, H), jnp.float32) * std
    wk = jax.random.normal(ks[1], (H, H), jnp.float32) * std
    wv = jax.random.normal(ks[2], (H, H), jnp.float32) * std
    wqkv = jnp.concatenate([wq, wk, wv], axis=1)          # fused [H, 3H]
    bqkv = jnp.zeros((1, 3 * H), jnp.float32)
    wo = jax.random.normal(ks[3], (H, H), jnp.float32) * std
    w1 = jax.random.normal(ks[4], (H, I), jnp.float32) * std
    b1 = jnp.zeros((1, I), jnp.float32)
    w2 = jax.random.normal(ks[5], (I, H), jnp.float32) * std
    # packed per-channel vectors: [n1w, n1b, n2w, n2b, bo, b2] -> [6, H]
    vecs = jnp.stack([
        jnp.ones((H,), jnp.float32),    # norm1 weight
        jnp.zeros((H,), jnp.float32),   # norm1 bias
        jnp.ones((H,), jnp.float32),    # norm2 weight
        jnp.zeros((H,), jnp.float32),   # norm2 bias
        jnp.zeros((H,), jnp.float32),   # attention output projection bias
        jnp.zeros((H,), jnp.float32),   # FFN second linear bias
    ], axis=0)
    return (wqkv, bqkv, wo, vecs, w1, b1, w2)


def reference_forward(x, biases, params):
    """Pure-JAX reference (same eval-mode semantics) for a sanity check."""
    wqkv, bqkv, wo, vecs, w1, b1, w2 = params
    n1w, n1b, n2w, n2b, bo, b2 = (vecs[i] for i in range(6))

    def ln(v, w, b):
        mu = v.mean(-1, keepdims=True)
        var = ((v - mu) ** 2).mean(-1, keepdims=True)
        return (v - mu) / jnp.sqrt(var + EPS) * w + b

    xn = ln(x, n1w, n1b)
    qkv = xn @ wqkv + bqkv[0]
    q, k, v = qkv[..., :H], qkv[..., H:2 * H], qkv[..., 2 * H:]

    def heads(t):
        return t.reshape(B, S, NH, HD).transpose(0, 2, 1, 3)

    qh, kh, vh = heads(q), heads(k), heads(v)
    scores = jnp.einsum('bhqd,bhkd->bhqk', qh, kh) / math.sqrt(HD) + biases[None]
    p = jax.nn.softmax(scores, axis=-1)
    ctx = jnp.einsum('bhqk,bhkd->bhqd', p, vh).transpose(0, 2, 1, 3).reshape(B, S, H)
    attn = ctx @ wo + bo
    h1 = x + attn
    h1n = ln(h1, n2w, n2b)
    ff = jax.nn.gelu(h1n @ w1 + b1[0], approximate=True) @ w2 + b2
    return h1 + ff


if __name__ == "__main__":
    key = jax.random.PRNGKey(0)
    k_x, k_b, k_p = jax.random.split(key, 3)

    x = jax.random.normal(k_x, (B, S, H), jnp.float32)
    biases = jax.random.normal(k_b, (NH, S, S), jnp.float32) * 0.1
    params = init_params(k_p)

    out = encoder_forward(x, biases, params)
    out = jax.block_until_ready(out)

    assert out.shape == (B, S, H) and out.dtype == jnp.float32
    assert bool(jnp.all(jnp.isfinite(out)))

    ref = reference_forward(x, biases, params)
    assert bool(jnp.allclose(out, ref, atol=2e-2, rtol=2e-2))

    print("KERNEL_OK")
</pallas_src>

<mosaic_0001>
module attributes {stable_mosaic.version = 11 : i64} {
  func.func @encoder_kernel(%arg0: memref<16x32xf32, #tpu.memory_space<vmem>>, %arg1: memref<64x16xf32, #tpu.memory_space<vmem>>, %arg2: memref<64x32xf32, #tpu.memory_space<vmem>>, %arg3: memref<64x16xf32, #tpu.memory_space<vmem>>, %arg4: memref<16x64xf32, #tpu.memory_space<vmem>>, %arg5: memref<32x96xf32, #tpu.memory_space<vmem>>, %arg6: memref<1x96xf32, #tpu.memory_space<vmem>>, %arg7: memref<32x32xf32, #tpu.memory_space<vmem>>, %arg8: memref<6x32xf32, #tpu.memory_space<vmem>>, %arg9: memref<32x64xf32, #tpu.memory_space<vmem>>, %arg10: memref<1x64xf32, #tpu.memory_space<vmem>>, %arg11: memref<64x32xf32, #tpu.memory_space<vmem>>, %arg12: memref<16x32xf32, #tpu.memory_space<vmem>>) attributes {dimension_semantics = [], scalar_prefetch = 0 : i64, scratch_operands = 0 : i64, tpu.core_type = #tpu.core_type<tc>} {
    %c0 = arith.constant 0 : index
    %c0_0 = arith.constant 0 : index
    %0 = vector.load %arg0[%c0, %c0_0] : memref<16x32xf32, #tpu.memory_space<vmem>>, vector<16x32xf32>
    %c0_1 = arith.constant 0 : index
    %c0_2 = arith.constant 0 : index
    %1 = vector.load %arg8[%c0_1, %c0_2] : memref<6x32xf32, #tpu.memory_space<vmem>>, vector<6x32xf32>
    %2 = vector.extract_strided_slice %1 {offsets = [0, 0], sizes = [1, 32], strides = [1, 1]} : vector<6x32xf32> to vector<1x32xf32>
    %3 = vector.extract_strided_slice %1 {offsets = [1, 0], sizes = [1, 32], strides = [1, 1]} : vector<6x32xf32> to vector<1x32xf32>
    %cst = arith.constant dense<0.000000e+00> : vector<16xf32>
    %4 = vector.multi_reduction <add>, %0, %cst [1] : vector<16x32xf32> to vector<16xf32>
    %5 = vector.shape_cast %4 : vector<16xf32> to vector<16x1xf32>
    %cst_3 = arith.constant 3.200000e+01 : f32
    %6 = vector.broadcast %cst_3 : f32 to vector<16x1xf32>
    %7 = arith.divf %5, %6 : vector<16x1xf32>
    %8 = vector.broadcast %7 : vector<16x1xf32> to vector<16x32xf32>
    %9 = arith.subf %0, %8 : vector<16x32xf32>
    %10 = arith.mulf %9, %9 : vector<16x32xf32>
    %cst_4 = arith.constant dense<0.000000e+00> : vector<16xf32>
    %11 = vector.multi_reduction <add>, %10, %cst_4 [1] : vector<16x32xf32> to vector<16xf32>
    %12 = vector.shape_cast %11 : vector<16xf32> to vector<16x1xf32>
    %cst_5 = arith.constant 3.200000e+01 : f32
    %13 = vector.broadcast %cst_5 : f32 to vector<16x1xf32>
    %14 = arith.divf %12, %13 : vector<16x1xf32>
    %15 = vector.broadcast %7 : vector<16x1xf32> to vector<16x32xf32>
    %16 = arith.subf %0, %15 : vector<16x32xf32>
    %cst_6 = arith.constant 9.99999997E-7 : f32
    %17 = vector.broadcast %cst_6 : f32 to vector<16x1xf32>
    %18 = arith.addf %14, %17 : vector<16x1xf32>
    %19 = math.rsqrt %18 : vector<16x1xf32>
    %20 = vector.broadcast %19 : vector<16x1xf32> to vector<16x32xf32>
    %21 = arith.mulf %16, %20 : vector<16x32xf32>
    %22 = vector.broadcast %2 : vector<1x32xf32> to vector<16x32xf32>
    %23 = arith.mulf %21, %22 : vector<16x32xf32>
    %24 = vector.broadcast %3 : vector<1x32xf32> to vector<16x32xf32>
    %25 = arith.addf %23, %24 : vector<16x32xf32>
    %c0_7 = arith.constant 0 : index
    %c0_8 = arith.constant 0 : index
    %26 = vector.load %arg5[%c0_7, %c0_8] : memref<32x96xf32, #tpu.memory_space<vmem>>, vector<32x96xf32>
    %cst_9 = arith.constant dense<0.000000e+00> : vector<16x96xf32>
    %27 = tpu.matmul %25, %26, %cst_9 {dimension_numbers = #tpu.dot_dimension_numbers<[1], [0], [0], [1], [0, 0, 1, 1], [], []>} : vector<16x32xf32>, vector<32x96xf32>, vector<16x96xf32> -> vector<16x96xf32>
    %c0_10 = arith.constant 0 : index
    %c0_11 = arith.constant 0 : index
    %28 = vector.load %arg6[%c0_10, %c0_11] : memref<1x96xf32, #tpu.memory_space<vmem>>, vector<1x96xf32>
    %29 = vector.broadcast %28 : vector<1x96xf32> to vector<16x96xf32>
    %30 = arith.addf %27, %29 : vector<16x96xf32>
    %31 = vector.extract_strided_slice %30 {offsets = [0, 0], sizes = [16, 32], strides = [1, 1]} : vector<16x96xf32> to vector<16x32xf32>
    %32 = vector.extract_strided_slice %30 {offsets = [0, 32], sizes = [16, 32], strides = [1, 1]} : vector<16x96xf32> to vector<16x32xf32>
    %33 = vector.extract_strided_slice %30 {offsets = [0, 64], sizes = [16, 32], strides = [1, 1]} : vector<16x96xf32> to vector<16x32xf32>
    %c0_12 = arith.constant 0 : index
    %c0_13 = arith.constant 0 : index
    %34 = vector.load %arg2[%c0_12, %c0_13] : memref<64x32xf32, #tpu.memory_space<vmem>>, vector<64x32xf32>
    %c0_14 = arith.constant 0 : index
    %c0_15 = arith.constant 0 : index
    %35 = vector.load %arg3[%c0_14, %c0_15] : memref<64x16xf32, #tpu.memory_space<vmem>>, vector<64x16xf32>
    %cst_16 = arith.constant dense<0.000000e+00> : vector<64x32xf32>
    %36 = tpu.matmul %35, %31, %cst_16 {dimension_numbers = #tpu.dot_dimension_numbers<[1], [0], [0], [1], [0, 0, 1, 1], [], []>} : vector<64x16xf32>, vector<16x32xf32>, vector<64x32xf32> -> vector<64x32xf32>
    %37 = arith.mulf %36, %34 : vector<64x32xf32>
    %cst_17 = arith.constant dense<0.000000e+00> : vector<64x16xf32>
    %38 = tpu.matmul %37, %32, %cst_17 {dimension_numbers = #tpu.dot_dimension_numbers<[1], [1], [0], [0], [0, 0, 1, 0], [], []>} : vector<64x32xf32>, vector<16x32xf32>, vector<64x16xf32> -> vector<64x16xf32>
    %cst_18 = arith.constant 0.353553385 : f32
    %39 = vector.broadcast %cst_18 : f32 to vector<64x16xf32>
    %40 = arith.mulf %38, %39 : vector<64x16xf32>
    %c0_19 = arith.constant 0 : index
    %c0_20 = arith.constant 0 : index
    %41 = vector.load %arg1[%c0_19, %c0_20] : memref<64x16xf32, #tpu.memory_space<vmem>>, vector<64x16xf32>
    %42 = arith.addf %40, %41 : vector<64x16xf32>
    %cst_21 = arith.constant dense<0xFF800000> : vector<64xf32>
    %43 = vector.multi_reduction <maximumf>, %42, %cst_21 [1] : vector<64x16xf32> to vector<64xf32>
    %44 = vector.shape_cast %43 : vector<64xf32> to vector<64x1xf32>
    %45 = vector.broadcast %44 : vector<64x1xf32> to vector<64x16xf32>
    %46 = arith.subf %42, %45 : vector<64x16xf32>
    %47 = math.exp %46 : vector<64x16xf32>
    %cst_22 = arith.constant dense<0.000000e+00> : vector<64xf32>
    %48 = vector.multi_reduction <add>, %47, %cst_22 [1] : vector<64x16xf32> to vector<64xf32>
    %49 = vector.shape_cast %48 : vector<64xf32> to vector<64x1xf32>
    %50 = tpu.reciprocal %49 {approx = true} : vector<64x1xf32> -> vector<64x1xf32>
    %51 = vector.broadcast %50 : vector<64x1xf32> to vector<64x16xf32>
    %52 = arith.mulf %47, %51 : vector<64x16xf32>
    %cst_23 = arith.constant dense<0.000000e+00> : vector<64x32xf32>
    %53 = tpu.matmul %52, %33, %cst_23 {dimension_numbers = #tpu.dot_dimension_numbers<[1], [0], [0], [1], [0, 0, 1, 1], [], []>} : vector<64x16xf32>, vector<16x32xf32>, vector<64x32xf32> -> vector<64x32xf32>
    %54 = arith.mulf %53, %34 : vector<64x32xf32>
    %c0_24 = arith.constant 0 : index
    %c0_25 = arith.constant 0 : index
    %55 = vector.load %arg4[%c0_24, %c0_25] : memref<16x64xf32, #tpu.memory_space<vmem>>, vector<16x64xf32>
    %cst_26 = arith.constant dense<0.000000e+00> : vector<16x32xf32>
    %56 = tpu.matmul %55, %54, %cst_26 {dimension_numbers = #tpu.dot_dimension_numbers<[1], [0], [0], [1], [0, 0, 1, 1], [], []>} : vector<16x64xf32>, vector<64x32xf32>, vector<16x32xf32> -> vector<16x32xf32>
    %c0_27 = arith.constant 0 : index
    %c0_28 = arith.constant 0 : index
    %57 = vector.load %arg7[%c0_27, %c0_28] : memref<32x32xf32, #tpu.memory_space<vmem>>, vector<32x32xf32>
    %cst_29 = arith.constant dense<0.000000e+00> : vector<16x32xf32>
    %58 = tpu.matmul %56, %57, %cst_29 {dimension_numbers = #tpu.dot_dimension_numbers<[1], [0], [0], [1], [0, 0, 1, 1], [], []>} : vector<16x32xf32>, vector<32x32xf32>, vector<16x32xf32> -> vector<16x32xf32>
    %59 = vector.extract_strided_slice %1 {offsets = [4, 0], sizes = [1, 32], strides = [1, 1]} : vector<6x32xf32> to vector<1x32xf32>
    %60 = vector.broadcast %59 : vector<1x32xf32> to vector<16x32xf32>
    %61 = arith.addf %58, %60 : vector<16x32xf32>
    %62 = arith.addf %0, %61 : vector<16x32xf32>
    %63 = vector.extract_strided_slice %1 {offsets = [2, 0], sizes = [1, 32], strides = [1, 1]} : vector<6x32xf32> to vector<1x32xf32>
    %64 = vector.extract_strided_slice %1 {offsets = [3, 0], sizes = [1, 32], strides = [1, 1]} : vector<6x32xf32> to vector<1x32xf32>
    %cst_30 = arith.constant dense<0.000000e+00> : vector<16xf32>
    %65 = vector.multi_reduction <add>, %62, %cst_30 [1] : vector<16x32xf32> to vector<16xf32>
    %66 = vector.shape_cast %65 : vector<16xf32> to vector<16x1xf32>
    %cst_31 = arith.constant 3.200000e+01 : f32
    %67 = vector.broadcast %cst_31 : f32 to vector<16x1xf32>
    %68 = arith.divf %66, %67 : vector<16x1xf32>
    %69 = vector.broadcast %68 : vector<16x1xf32> to vector<16x32xf32>
    %70 = arith.subf %62, %69 : vector<16x32xf32>
    %71 = arith.mulf %70, %70 : vector<16x32xf32>
    %cst_32 = arith.constant dense<0.000000e+00> : vector<16xf32>
    %72 = vector.multi_reduction <add>, %71, %cst_32 [1] : vector<16x32xf32> to vector<16xf32>
    %73 = vector.shape_cast %72 : vector<16xf32> to vector<16x1xf32>
    %cst_33 = arith.constant 3.200000e+01 : f32
    %74 = vector.broadcast %cst_33 : f32 to vector<16x1xf32>
    %75 = arith.divf %73, %74 : vector<16x1xf32>
    %76 = vector.broadcast %68 : vector<16x1xf32> to vector<16x32xf32>
    %77 = arith.subf %62, %76 : vector<16x32xf32>
    %cst_34 = arith.constant 9.99999997E-7 : f32
    %78 = vector.broadcast %cst_34 : f32 to vector<16x1xf32>
    %79 = arith.addf %75, %78 : vector<16x1xf32>
    %80 = math.rsqrt %79 : vector<16x1xf32>
    %81 = vector.broadcast %80 : vector<16x1xf32> to vector<16x32xf32>
    %82 = arith.mulf %77, %81 : vector<16x32xf32>
    %83 = vector.broadcast %63 : vector<1x32xf32> to vector<16x32xf32>
    %84 = arith.mulf %82, %83 : vector<16x32xf32>
    %85 = vector.broadcast %64 : vector<1x32xf32> to vector<16x32xf32>
    %86 = arith.addf %84, %85 : vector<16x32xf32>
    %c0_35 = arith.constant 0 : index
    %c0_36 = arith.constant 0 : index
    %87 = vector.load %arg9[%c0_35, %c0_36] : memref<32x64xf32, #tpu.memory_space<vmem>>, vector<32x64xf32>
    %cst_37 = arith.constant dense<0.000000e+00> : vector<16x64xf32>
    %88 = tpu.matmul %86, %87, %cst_37 {dimension_numbers = #tpu.dot_dimension_numbers<[1], [0], [0], [1], [0, 0, 1, 1], [], []>} : vector<16x32xf32>, vector<32x64xf32>, vector<16x64xf32> -> vector<16x64xf32>
    %c0_38 = arith.constant 0 : index
    %c0_39 = arith.constant 0 : index
    %89 = vector.load %arg10[%c0_38, %c0_39] : memref<1x64xf32, #tpu.memory_space<vmem>>, vector<1x64xf32>
    %90 = vector.broadcast %89 : vector<1x64xf32> to vector<16x64xf32>
    %91 = arith.addf %88, %90 : vector<16x64xf32>
    %92 = arith.mulf %91, %91 : vector<16x64xf32>
    %93 = arith.mulf %91, %92 : vector<16x64xf32>
    %cst_40 = arith.constant 4.471500e-02 : f32
    %94 = vector.broadcast %cst_40 : f32 to vector<16x64xf32>
    %95 = arith.mulf %94, %93 : vector<16x64xf32>
    %96 = arith.addf %91, %95 : vector<16x64xf32>
    %cst_41 = arith.constant 0.797884583 : f32
    %97 = vector.broadcast %cst_41 : f32 to vector<16x64xf32>
    %98 = arith.mulf %97, %96 : vector<16x64xf32>
    %99 = math.tanh %98 : vector<16x64xf32>
    %cst_42 = arith.constant 1.000000e+00 : f32
    %100 = vector.broadcast %cst_42 : f32 to vector<16x64xf32>
    %101 = arith.addf %100, %99 : vector<16x64xf32>
    %cst_43 = arith.constant 5.000000e-01 : f32
    %102 = vector.broadcast %cst_43 : f32 to vector<16x64xf32>
    %103 = arith.mulf %102, %101 : vector<16x64xf32>
    %104 = arith.mulf %91, %103 : vector<16x64xf32>
    %c0_44 = arith.constant 0 : index
    %c0_45 = arith.constant 0 : index
    %105 = vector.load %arg11[%c0_44, %c0_45] : memref<64x32xf32, #tpu.memory_space<vmem>>, vector<64x32xf32>
    %cst_46 = arith.constant dense<0.000000e+00> : vector<16x32xf32>
    %106 = tpu.matmul %104, %105, %cst_46 {dimension_numbers = #tpu.dot_dimension_numbers<[1], [0], [0], [1], [0, 0, 1, 1], [], []>} : vector<16x64xf32>, vector<64x32xf32>, vector<16x32xf32> -> vector<16x32xf32>
    %107 = vector.extract_strided_slice %1 {offsets = [5, 0], sizes = [1, 32], strides = [1, 1]} : vector<6x32xf32> to vector<1x32xf32>
    %108 = vector.broadcast %107 : vector<1x32xf32> to vector<16x32xf32>
    %109 = arith.addf %106, %108 : vector<16x32xf32>
    %110 = arith.addf %62, %109 : vector<16x32xf32>
    %c0_47 = arith.constant 0 : index
    %c0_48 = arith.constant 0 : index
    %111 = vector.load %arg12[%c0_47, %c0_48] : memref<16x32xf32, #tpu.memory_space<vmem>>, vector<16x32xf32>
    tpu.vector_store %arg12[%c0_47, %c0_48], %110 {strides = array<i32>} : memref<16x32xf32, #tpu.memory_space<vmem>>, vector<16x32xf32>,
    return
  }
}

</mosaic_0001>

<bundles_post_ra>
// kernel: tile.6
= control target key start
LH: loop header
LB: loop body
LE: loop exit
PB: predicated region body
PF: predicated region fallthrough
CT: control target
= control target key end

     0   :  { %s154_s0 = inlined_call_operand.vmem [shape: f32[32,8], index: 0, kind: input, shape index: {}]   ;;  %s155_s1 = inlined_call_operand.vmem [shape: f32[2,32,2,8], index: 1, kind: output, shape index: {}]  }
   0x1   :  { %v4_v0 = vld [vmem:[%s154_s0] ss:$0 sm:$0xff]  ;;  %v51_v1 = vld [vmem:[%s154_s0 + $0x1] ss:$0 sm:$0xff]  ;;  %v54_v2 = vld [vmem:[%s154_s0 + $0x2] ss:$0 sm:$0xff] }
   0x2   :  { %5 = vst [vmem:[%s155_s1] sm:$0x3] %v4_v0  ;;  %50 = vst [vmem:[%s155_s1 + $0x10] sm:$0x3] %v4_v0  ;;  %v57_v3 = vld [vmem:[%s154_s0 + $0x3] ss:$0 sm:$0xff] }
   0x3   :  { %52 = vst [vmem:[%s155_s1 + $0x2] sm:$0x3] %v51_v1  ;;  %53 = vst [vmem:[%s155_s1 + $0x12] sm:$0x3] %v51_v1  ;;  %v60_v4 = vld [vmem:[%s154_s0 + $0x4] ss:$0 sm:$0xff] }
   0x4   :  { %55 = vst [vmem:[%s155_s1 + $0x4] sm:$0x3] %v54_v2  ;;  %56 = vst [vmem:[%s155_s1 + $0x14] sm:$0x3] %v54_v2  ;;  %v63_v5 = vld [vmem:[%s154_s0 + $0x5] ss:$0 sm:$0xff] }
   0x5   :  { %58 = vst [vmem:[%s155_s1 + $0x6] sm:$0x3] %v57_v3  ;;  %59 = vst [vmem:[%s155_s1 + $0x16] sm:$0x3] %v57_v3  ;;  %v66_v6 = vld [vmem:[%s154_s0 + $0x6] ss:$0 sm:$0xff] }
   0x6   :  { %61 = vst [vmem:[%s155_s1 + $0x8] sm:$0x3] %v60_v4  ;;  %62 = vst [vmem:[%s155_s1 + $0x18] sm:$0x3] %v60_v4  ;;  %v69_v7 = vld [vmem:[%s154_s0 + $0x7] ss:$0 sm:$0xff] }
   0x7   :  { %64 = vst [vmem:[%s155_s1 + $0xa] sm:$0x3] %v63_v5  ;;  %65 = vst [vmem:[%s155_s1 + $0x1a] sm:$0x3] %v63_v5 }
   0x8   :  { %67 = vst [vmem:[%s155_s1 + $0xc] sm:$0x3] %v66_v6  ;;  %68 = vst [vmem:[%s155_s1 + $0x1c] sm:$0x3] %v66_v6 }
   0x9   :  { %70 = vst [vmem:[%s155_s1 + $0xe] sm:$0x3] %v69_v7  ;;  %71 = vst [vmem:[%s155_s1 + $0x1e] sm:$0x3] %v69_v7 }

// kernel: tile.7
= control target key start
LH: loop header
LB: loop body
LE: loop exit
PB: predicated region body
PF: predicated region fallthrough
CT: control target
= control target key end

     0   :  { %vm83_vm0 = vcmask 1047556   ;;  %vm85_vm1 = vcmask 261120   ;;  %vm104_vm2 = vcmask 523520   ;;  %s226_s0 = inlined_call_operand.vmem [shape: f32[2,32,2,8], index: 0, kind: input, shape index: {}]   ;;  %s227_s1 = inlined_call_operand.vmem [shape: f32[64,16], index: 1, kind: output, shape index: {}]  }
   0x1   :  { %v139_v0 = vld [vmem:[%s226_s0 + $0xe] sm:$0x3]  ;;  %v140_v1 = vld [vmem:[%s226_s0 + $0xc] sm:$0x3]  ;;  %v141_v2 = vld [vmem:[%s226_s0 + $0xa] sm:$0x3] }
   0x2   :  { %49 = vst [vmem:[#allocation0 + $0x38] sm:$0x3] %v139_v0  ;;  %54 = vst [vmem:[#allocation0 + $0x30] sm:$0x3] %v140_v1  ;;  %v142_v3 = vld [vmem:[%s226_s0 + $0x8] sm:$0x3] }
   0x3   :  { %59 = vst [vmem:[#allocation0 + $0x28] sm:$0x3] %v141_v2  ;;  %v143_v4 = vld [vmem:[%s226_s0 + $0x6] sm:$0x3]  ;;  %v144_v5 = vld [vmem:[%s226_s0 + $0x4] sm:$0x3] }
   0x4   :  { %64 = vst [vmem:[#allocation0 + $0x20] sm:$0x3] %v142_v3  ;;  %69 = vst [vmem:[#allocation0 + $0x18] sm:$0x3] %v143_v4  ;;  %v145_v6 = vld [vmem:[%s226_s0 + $0x2] sm:$0x3] }
   0x5   :  { %74 = vst [vmem:[#allocation0 + $0x10] sm:$0x3] %v144_v5  ;;  %v79_v7 = vld [vmem:[%s226_s0] sm:$0x3]  ;;  %78 = vst [vmem:[#allocation0 + $0x8] sm:$0x3] %v145_v6 }
   0x6   :  { %80 = vst [vmem:[#allocation0] sm:$0x3] %v79_v7  ;;  %v131_v8 = vld [vmem:[%s226_s0 + $0x1e] sm:$0x3]  ;;  %v132_v9 = vld [vmem:[%s226_s0 + $0x1c] sm:$0x3] }
   0x7   :  { %v133_v10 = vld [vmem:[%s226_s0 + $0x1a] sm:$0x3]  ;;  %9 = vst [vmem:[#allocation0 + $0x78] sm:$0x3] %v131_v8  ;;  %14 = vst [vmem:[#allocation0 + $0x70] sm:$0x3] %v132_v9 }
   0x8   :  { %19 = vst [vmem:[#allocation0 + $0x68] sm:$0x3] %v133_v10  ;;  %v134_v11 = vld [vmem:[%s226_s0 + $0x18] sm:$0x3]  ;;  %v135_v12 = vld [vmem:[%s226_s0 + $0x16] sm:$0x3] }
   0x9   :  { %v136_v13 = vld [vmem:[%s226_s0 + $0x14] sm:$0x3]  ;;  %24 = vst [vmem:[#allocation0 + $0x60] sm:$0x3] %v134_v11  ;;  %29 = vst [vmem:[#allocation0 + $0x58] sm:$0x3] %v135_v12 }
   0xa   :  { %34 = vst [vmem:[#allocation0 + $0x50] sm:$0x3] %v136_v13  ;;  %v137_v14 = vld [vmem:[%s226_s0 + $0x12] sm:$0x3]  ;;  %v138_v15 = vld [vmem:[%s226_s0 + $0x10] sm:$0x3] }
   0xb   :  { %39 = vst [vmem:[#allocation0 + $0x48] sm:$0x3] %v137_v14  ;;  %44 = vst [vmem:[#allocation0 + $0x40] sm:$0x3] %v138_v15  ;;  %s149_s0 = smov 32  }
   0xc   :  { %v99_v16 = vld [vmem:[#allocation0 + $0x1] ss:$8 sm:$0xf0]   ;;  %v82_v17 = vld [vmem:[#allocation0] ss:$8 sm:$0xf0]  }
   0xd   :  { %v97_v18 = vld [vmem:[#allocation0 + $0x1] ss:$8 sm:$0xf]   ;;  %v81_v19 = vld [vmem:[#allocation0] ss:$8 sm:$0xf]  }
   0xe   :  { %v101_v20 = vsel %vm83_vm0, %v99_v16, %v97_v18  ;;  %v84_v21 = vsel %vm83_vm0, %v82_v17, %v81_v19 }
   0xf   :  { %102 = vrot.lane.b32.xlu0 %v101_v20, %s149_s0  ;;  %86 = vst.msk [vmem:[%s227_s1] sm:$0xff] %vm85_vm1, %v84_v21  }
  0x10   :  { %v109_v22 = vld [vmem:[#allocation0 + $0x41] ss:$8 sm:$0xf0]   ;;  %v90_v23 = vld [vmem:[#allocation0 + $0x40] ss:$8 sm:$0xf0]  }
  0x12   :  { %v107_v24 = vld [vmem:[#allocation0 + $0x41] ss:$8 sm:$0xf]   ;;  %v88_v25 = vld [vmem:[#allocation0 + $0x40] ss:$8 sm:$0xf]  }
  0x13   :  { %v111_v26 = vsel %vm83_vm0, %v109_v22, %v107_v24  ;;  %v92_v27 = vsel %vm83_vm0, %v90_v23, %v88_v25 }
  0x14   :  { %146 = vst.msk [vmem:[%s227_s1 + $0x8] sm:$0xff] %vm85_vm1, %v92_v27   ;;  %112 = vrot.lane.b32.xlu0 %v111_v26, %s149_s0 }
  0x81   :  { %v103_v28 = vpop.permute.xlu0 %102  }
  0x82   :  { %105 = vst.msk [vmem:[%s227_s1] sm:$0xff] %vm104_vm2, %v103_v28  }
  0x86   :  { %v113_v29 = vpop.permute.xlu0 %112  }
  0x87   :  { %147 = vst.msk [vmem:[%s227_s1 + $0x8] sm:$0xff] %vm104_vm2, %v113_v29  }

// kernel: encoder_forward.1
= control target key start
LH: loop header
LB: loop body
LE: loop exit
PB: predicated region body
PF: predicated region fallthrough
CT: control target
= control target key end

     0   :  { %vm45_vm0 = vcmask 261120   ;;  %s1835_s0 = inlined_call_operand.vmem [shape: f32[16,32], index: 0, kind: input, shape index: {}]   ;;  %s1836_s1 = inlined_call_operand.vmem [shape: f32[64,16], index: 1, kind: input, shape index: {}]   ;;  %s1837_s2 = inlined_call_operand.vmem [shape: f32[64,32], index: 2, kind: input, shape index: {}]   ;;  %s1838_s3 = inlined_call_operand.vmem [shape: f32[64,16], index: 3, kind: input, shape index: {}]   ;;  %s1839_s4 = inlined_call_operand.vmem [shape: f32[16,64], index: 4, kind: input, shape index: {}]   ;;  %s1840_s5 = inlined_call_operand.vmem [shape: f32[32,96], index: 5, kind: input, shape index: {}]   ;;  %s1841_s6 = inlined_call_operand.vmem [shape: f32[1,96], index: 6, kind: input, shape index: {}]   ;;  %s1842_s7 = inlined_call_operand.vmem [shape: f32[32,32], index: 7, kind: input, shape index: {}]   ;;  %s1843_s8 = inlined_call_operand.vmem [shape: f32[6,32], index: 8, kind: input, shape index: {}]   ;;  %s1844_s9 = inlined_call_operand.vmem [shape: f32[32,64], index: 9, kind: input, shape index: {}]   ;;  %s1845_s10 = inlined_call_operand.vmem [shape: f32[1,64], index: 10, kind: input, shape index: {}]   ;;  %s1846_s11 = inlined_call_operand.vmem [shape: f32[64,32], index: 11, kind: input, shape index: {}]   ;;  %s1847_s12 = inlined_call_operand.hbm [shape: f32[16,32], index: 12, kind: output, shape index: {}]  }
   0x1   :  { %v1534_v0 = vld [vmem:[%s1835_s0] sm:$0xff]  ;;  %v1539_v1 = vld [vmem:[%s1835_s0 + $0x8] sm:$0xff] }
   0x2   :  { %17 = vsyncpa [#allocation3], 0  ;;  %v46_v2 = vsel %vm45_vm0, %v1534_v0, 0.0  ;;  %v49_v3 = vsel %vm45_vm0, %v1539_v1, 0.0  ;;  %v88_v14 = vld [vmem:[%s1840_s5 + $0x18] sm:$0xff]  ;;  %v87_v15 = vld [vmem:[%s1840_s5 + $0x10] sm:$0xff]  ;;  %v73_v23 = vlaneseq }
   0x3   :  { %47 = vadd.xlane.f32.xlu0 %v46_v2  ;;  %1267 = vmatprep.subr.mxu0 %v88_v14  ;;  %v86_v16 = vld [vmem:[%s1840_s5 + $0x8] sm:$0xff]  ;;  %v85_v17 = vld [vmem:[%s1840_s5] sm:$0xff]  ;;  %vm193_vm1 = vcmask 130048   ;;  %s1461_s20 = smov 96   ;;  %v187_v48 = vld [vmem:[%s1838_s3 + $0x10] sm:$0xff]  ;;  %vm727_vm2 = vcmask 523264  }
   0x4   :  { %1268 = vmatpush3.msra.mxu0 %v88_v14  ;;  %v1561_v25 = vshrl.u32 %v73_v23, 7  ;;  %v1567_v27 = vld [vmem:[%s1843_s8] sm:$0x3f]  ;;  %v186_v46 = vld [vmem:[%s1838_s3 + $0x8] sm:$0xff]  ;;  %v191_v49 = vld [vmem:[%s1838_s3 + $0x30] sm:$0xff] }
   0x5   :  { %1269 = vmatprep.subr.mxu0 %v87_v15  ;;  %v185_v39 = vld [vmem:[%s1838_s3] sm:$0xff]  ;;  %v190_v47 = vld [vmem:[%s1838_s3 + $0x28] sm:$0xff]  ;;  %v188_v50 = vld [vmem:[%s1838_s3 + $0x18] sm:$0xff] }
   0x6   :  { %1270 = vmatpush3.msra.mxu0 %v87_v15  ;;  %v75_v26 = vsub.s32 0, %v1561_v25  ;;  %v81_v28 = vsub.s32 1, %v1561_v25  ;;  %v189_v40 = vld [vmem:[%s1838_s3 + $0x20] sm:$0xff]  ;;  %v192_v51 = vld [vmem:[%s1838_s3 + $0x38] sm:$0xff]  ;;  %v1635_v57 = vld [vmem:[%s1837_s2 + $0x8] sm:$0xff] }
   0x7   :  { %50 = vadd.xlane.f32.xlu0 %v49_v3  ;;  %1271 = vmatprep.subr.mxu0 %v86_v16  ;;  %v1161_v41 = vld [vmem:[%s1841_s6] ss:$0 sm:$0xff]  ;;  %v1642_v63 = vld [vmem:[%s1837_s2 + $0x10] sm:$0xff]  ;;  %v1677_v14 = vld [vmem:[%s1837_s2 + $0x38] sm:$0xff] }
   0x8   :  { %1272 = vmatpush3.msra.mxu0 %v86_v16  ;;  %v76_v29 = vrot.slane %v1567_v27, %v75_v26  ;;  %v82_v32 = vrot.slane %v1567_v27, %v81_v28  ;;  %1288 = vmatprep.mubr.msk.f32.mxu1 %vm193_vm1, %v189_v40  ;;  %v1630_v55 = vld [vmem:[%s1837_s2] sm:$0xff] }
   0x9   :  { %1273 = vmatprep.subr.mxu0 %v85_v17  ;;  %v1647_v2 = vld [vmem:[%s1837_s2 + $0x20] sm:$0xff] }
   0xa   :  { %1274 = vmatpush3.msra.mxu0 %v85_v17  ;;  %v479_v17 = vld [vmem:[%s1836_s1 + $0x8] sm:$0xff]  ;;  %v482_v40 = vld [vmem:[%s1836_s1 + $0x20] sm:$0xff] }
  0x8c   :  { %v48_v4 = vpop.xlane.xlu0 %47 }
  0x8d   :  { %v53_v5 = vmul.f32 0.03125, %v48_v4  ;;  %v1652_v4 = vld [vmem:[%s1837_s2 + $0x18] sm:$0xff] }
  0x8f   :  { %v55_v6 = vsub.f32 %v1534_v0, %v53_v5 }
  0x90   :  { %v51_v7 = vpop.xlane.xlu0 %50 }
  0x91   :  { %v54_v8 = vmul.f32 0.03125, %v51_v7  ;;  %v57_v9 = vmul.f32 %v55_v6, %v55_v6 }
  0x93   :  { %v56_v10 = vsub.f32 %v1539_v1, %v54_v8  ;;  %v59_v11 = vsel %vm45_vm0, %v57_v9, 0.0  ;;  %v1662_v9 = vld [vmem:[%s1837_s2 + $0x30] sm:$0xff] }
  0x94   :  { %60 = vadd.xlane.f32.xlu1 %v59_v11  ;;  %v1667_v11 = vld [vmem:[%s1837_s2 + $0x28] sm:$0xff] }
  0x95   :  { %v58_v12 = vmul.f32 %v56_v10, %v56_v10 }
  0x97   :  { %v62_v13 = vsel %vm45_vm0, %v58_v12, 0.0 }
  0x98   :  { %63 = vadd.xlane.f32.xlu1 %v62_v13 }
 0x11d   :  { %v61_v18 = vpop.xlane.xlu1 %60 }
 0x11e   :  { %v65_v19 = vmul.f32 0.03125, %v61_v18 }
 0x120   :  { %v67_v20 = vadd.f32 1e-06, %v65_v19 }
 0x121   :  { %v64_v21 = vpop.xlane.xlu1 %63 }
 0x122   :  { %1395 = vrsqrt.f32 %v67_v20  ;;  %v66_v22 = vmul.f32 0.03125, %v64_v21  ;;  %v478_v20 = vld [vmem:[%s1836_s1] sm:$0xff] }
 0x124   :  { %v68_v24 = vadd.f32 1e-06, %v66_v22 }
 0x126   :  { %1397 = vrsqrt.f32 %v68_v24  ;;  %v481_v24 = vld [vmem:[%s1836_s1 + $0x18] sm:$0xff] }
 0x12f   :  { %v1396_v30 = vpop.eup %1395 }
 0x130   :  { %v71_v31 = vmul.f32 %v1396_v30, %v55_v6 }
 0x132   :  { %v77_v33 = vmul.f32 %v76_v29, %v71_v31  ;;  %v480_v31 = vld [vmem:[%s1836_s1 + $0x10] sm:$0xff] }
 0x133   :  { %v1398_v34 = vpop.eup %1397 }
 0x134   :  { %v72_v35 = vmul.f32 %v1398_v34, %v56_v10  ;;  %v83_v36 = vadd.f32 %v82_v32, %v77_v33 }
 0x136   :  { %v78_v37 = vmul.f32 %v76_v29, %v72_v35  ;;  %1275 = vmatprep.mubr.msk.f32.mxu0 %vm45_vm0, %v83_v36  ;;  %v483_v36 = vld [vmem:[%s1836_s1 + $0x28] sm:$0xff] }
 0x138   :  { %v84_v38 = vadd.f32 %v82_v32, %v78_v37 }
 0x13a   :  { %1276 = vmatmul.mubr.msk.f32.vlgmr.msra.gmra.mxu0 %vm45_vm0, %v84_v38 }
 0x13b   :  { %1282 = vmatprep.mubr.msk.f32.mxu0 %vm193_vm1, %v185_v39 }
 0x1fa   :  { %v1277_v42 = vpop.f32.mrf.mxu0 }
 0x1fb   :  { %v1585_v43 = vadd.f32 %v1277_v42, %v1161_v41 }
 0x1fc   :  { %v168_v44 = vpop.f32.mrf.mxu0 }
 0x1fd   :  { %v1587_v45 = vadd.f32 %v1161_v41, %v168_v44  ;;  %335 = vrot.lane.b32.xlu0 %v1585_v43, %s1461_s20  ;;  %1278 = vmatprep.subr.mxu0 %v1585_v43 }
 0x1fe   :  { %1386 = vmatprep.subr.mxu1 %v1585_v43  ;;  %1279 = vmatpush3.msra.mxu0 %v1585_v43 }
 0x1ff   :  { %1388 = vmatpush3.msra.mxu1 %v1585_v43  ;;  %333 = vrot.lane.b32.xlu1 %v1587_v45, %s1461_s20 }
 0x200   :  { %1280 = vmatprep.subr.mxu0 %v1587_v45  ;;  %1387 = vmatprep.subr.mxu1 %v1587_v45 }
 0x201   :  { %1281 = vmatpush3.msra.mxu0 %v1587_v45  ;;  %1389 = vmatpush3.msra.mxu1 %v1587_v45 }
 0x202   :  { %1283 = vmatmul.mubr.msk.f32.vlgmr.msra.gmra.mxu0 %vm193_vm1, %v186_v46  ;;  %1289 = vmatmul.mubr.msk.f32.vlgmr.msra.gmra.mxu1 %vm193_vm1, %v190_v47 }
 0x203   :  { %1285 = vmatprep.mubr.msk.f32.mxu0 %vm193_vm1, %v187_v48  ;;  %1291 = vmatprep.mubr.msk.f32.mxu1 %vm193_vm1, %v191_v49  ;;  %v485_v48 = vld [vmem:[%s1836_s1 + $0x38] sm:$0xff] }
 0x206   :  { %1286 = vmatmul.mubr.msk.f32.gmra.mxu0 %vm193_vm1, %v188_v50  ;;  %1292 = vmatmul.mubr.msk.f32.gmra.mxu1 %vm193_vm1, %v192_v51 }
 0x26f   :  { %v336_v52 = vpop.permute.xlu0 %335 }
 0x270   :  { %1294 = vmatprep.subr.msk.mxu0 %vm45_vm0, %v336_v52 }
 0x271   :  { %v334_v53 = vpop.permute.xlu1 %333  ;;  %1295 = vmatpush3.xpose.msk.msra.mxu0 %vm45_vm0, %v336_v52  ;;  %v484_v52 = vld [vmem:[%s1836_s1 + $0x30] sm:$0xff]  ;;  %s1462_s1 = smov 64  }
 0x272   :  { %1296 = vmatprep.subr.msk.mxu0 %vm45_vm0, %v334_v53 }
 0x275   :  { %1297 = vmatpush3.xpose.msk.msra.mxu0 %vm45_vm0, %v334_v53 }
 0x2c2   :  { %v1284_v54 = vpop.f32.mrf.mxu0  ;;  %v1290_v56 = vpop.f32.mrf.mxu1 }
 0x2c3   :  { %v324_v61 = vmul.f32 %v1284_v54, %v1635_v57  ;;  %v328_v13 = vmul.f32 %v1290_v56, %v1667_v11 }
 0x2c4   :  { %v284_v58 = vpop.f32.mrf.mxu0  ;;  %v304_v59 = vpop.f32.mrf.mxu1 }
 0x2c5   :  { %v323_v60 = vmul.f32 %v284_v58, %v1630_v55  ;;  %v327_v7 = vmul.f32 %v304_v59, %v1647_v2 }
 0x2c6   :  { %v1287_v62 = vpop.f32.mrf.mxu0  ;;  %v1293_v3 = vpop.f32.mrf.mxu1 }
 0x2c7   :  { %1298 = vmatprep.mubr.msk.f32.mxu0 %vm45_vm0, %v323_v60  ;;  %v326_v8 = vmul.f32 %v1287_v62, %v1652_v4  ;;  %v330_v15 = vmul.f32 %v1293_v3, %v1677_v14 }
 0x2c8   :  { %v294_v5 = vpop.f32.mrf.mxu0  ;;  %1299 = vmatmul.mubr.msk.f32.vlgmr.msra.gmra.mxu0 %vm45_vm0, %v324_v61  ;;  %v314_v10 = vpop.f32.mrf.mxu1 }
 0x2c9   :  { %v325_v6 = vmul.f32 %v294_v5, %v1642_v63  ;;  %v329_v12 = vmul.f32 %v314_v10, %v1662_v9 }
 0x2cb   :  { %1301 = vmatprep.mubr.msk.f32.mxu0 %vm45_vm0, %v325_v6 }
 0x2cc   :  { %1302 = vmatmul.mubr.msk.f32.gmra.mxu0 %vm45_vm0, %v326_v8 }
 0x2cd   :  { %1304 = vmatprep.mubr.msk.f32.mxu0 %vm45_vm0, %v327_v7 }
 0x2d0   :  { %1305 = vmatmul.mubr.msk.f32.gmra.mxu0 %vm45_vm0, %v328_v13 }
 0x2d1   :  { %1307 = vmatprep.mubr.msk.f32.mxu0 %vm45_vm0, %v329_v12 }
 0x2d4   :  { %1308 = vmatmul.mubr.msk.f32.gmra.mxu0 %vm45_vm0, %v330_v15 }
 0x388   :  { %v1300_v16 = vpop.f32.mrf.mxu0 }
 0x389   :  { %v471_v18 = vmul.f32 0.35355338, %v1300_v16 }
 0x38a   :  { %v431_v19 = vpop.f32.mrf.mxu0 }
 0x38b   :  { %v470_v21 = vmul.f32 0.35355338, %v431_v19  ;;  %v487_v22 = vadd.f32 %v479_v17, %v471_v18 }
 0x38c   :  { %v1303_v23 = vpop.f32.mrf.mxu0 }
 0x38d   :  { %v473_v26 = vmul.f32 0.35355338, %v1303_v23  ;;  %v497_v28 = vsel %vm193_vm1, %v487_v22, -inf  ;;  %v486_v29 = vadd.f32 %v478_v20, %v470_v21 }
 0x38e   :  { %498 = vmax.xlane.f32.xlu0 %v497_v28  ;;  %v441_v30 = vpop.f32.mrf.mxu0 }
 0x38f   :  { %v472_v32 = vmul.f32 0.35355338, %v441_v30  ;;  %v494_v33 = vsel %vm193_vm1, %v486_v29, -inf  ;;  %v489_v34 = vadd.f32 %v481_v24, %v473_v26 }
 0x390   :  { %495 = vmax.xlane.f32.xlu1 %v494_v33  ;;  %v1306_v35 = vpop.f32.mrf.mxu0 }
 0x391   :  { %v475_v37 = vmul.f32 0.35355338, %v1306_v35  ;;  %v488_v38 = vadd.f32 %v480_v31, %v472_v32  ;;  %v503_v42 = vsel %vm193_vm1, %v489_v34, -inf }
 0x392   :  { %v451_v39 = vpop.f32.mrf.mxu0 }
 0x393   :  { %v474_v41 = vmul.f32 0.35355338, %v451_v39  ;;  %v500_v44 = vsel %vm193_vm1, %v488_v38, -inf  ;;  %v491_v46 = vadd.f32 %v483_v36, %v475_v37 }
 0x394   :  { %504 = vmax.xlane.f32.xlu1 %v503_v42  ;;  %501 = vmax.xlane.f32.xlu0 %v500_v44  ;;  %v1309_v47 = vpop.f32.mrf.mxu0 }
 0x395   :  { %v477_v49 = vmul.f32 0.35355338, %v1309_v47  ;;  %v490_v50 = vadd.f32 %v482_v40, %v474_v41  ;;  %v509_v54 = vsel %vm193_vm1, %v491_v46, -inf }
 0x396   :  { %v461_v51 = vpop.f32.mrf.mxu0 }
 0x397   :  { %v476_v53 = vmul.f32 0.35355338, %v461_v51  ;;  %v506_v56 = vsel %vm193_vm1, %v490_v50, -inf  ;;  %v493_v58 = vadd.f32 %v485_v48, %v477_v49 }
 0x398   :  { %510 = vmax.xlane.f32.xlu1 %v509_v54  ;;  %507 = vmax.xlane.f32.xlu0 %v506_v56 }
 0x399   :  { %v492_v59 = vadd.f32 %v484_v52, %v476_v53  ;;  %v515_v60 = vsel %vm193_vm1, %v493_v58, -inf }
 0x39b   :  { %v512_v61 = vsel %vm193_vm1, %v492_v59, -inf }
 0x39c   :  { %516 = vmax.xlane.f32.xlu1 %v515_v60  ;;  %513 = vmax.xlane.f32.xlu0 %v512_v61 }
 0x417   :  { %v499_v62 = vpop.xlane.xlu0 %498 }
 0x418   :  { %v519_v3 = vsub.f32 %v487_v22, %v499_v62 }
 0x419   :  { %v496_v5 = vpop.xlane.xlu1 %495 }
 0x41a   :  { %v528_v6 = vmul.f32 1.442695, %v519_v3  ;;  %v518_v7 = vsub.f32 %v486_v29, %v496_v5 }
 0x41c   :  { %1399 = vpow2.f32 %v528_v6  ;;  %v526_v8 = vmul.f32 1.442695, %v518_v7 }
 0x41d   :  { %v505_v10 = vpop.xlane.xlu1 %504  ;;  %v502_v12 = vpop.xlane.xlu0 %501 }
 0x41e   :  { %1401 = vpow2.f32 %v526_v8  ;;  %v521_v13 = vsub.f32 %v489_v34, %v505_v10  ;;  %v520_v15 = vsub.f32 %v488_v38, %v502_v12 }
 0x420   :  { %v532_v16 = vmul.f32 1.442695, %v521_v13  ;;  %v530_v17 = vmul.f32 1.442695, %v520_v15 }
 0x421   :  { %v511_v18 = vpop.xlane.xlu1 %510  ;;  %v508_v19 = vpop.xlane.xlu0 %507 }
 0x422   :  { %1403 = vpow2.f32 %v532_v16  ;;  %v523_v20 = vsub.f32 %v491_v46, %v511_v18  ;;  %v522_v21 = vsub.f32 %v490_v50, %v508_v19 }
 0x423   :  { %1405 = vpow2.f32 %v530_v17 }
 0x424   :  { %v536_v23 = vmul.f32 1.442695, %v523_v20  ;;  %v534_v22 = vmul.f32 1.442695, %v522_v21  ;;  %v725_v20 = vld [vmem:[%s1839_s4] sm:$0xff]  ;;  %v812_v21 = vld [vmem:[%s1842_s7 + $0x18] sm:$0xff] }
 0x425   :  { %v517_v24 = vpop.xlane.xlu1 %516  ;;  %v514_v26 = vpop.xlane.xlu0 %513  ;;  %1342 = vmatprep.mubr.msk.f32.mxu0 %vm727_vm2, %v725_v20 }
 0x426   :  { %1407 = vpow2.f32 %v536_v23  ;;  %v525_v28 = vsub.f32 %v493_v58, %v517_v24  ;;  %v524_v29 = vsub.f32 %v492_v59, %v514_v26  ;;  %v811_v23 = vld [vmem:[%s1842_s7 + $0x10] sm:$0xff] }
 0x427   :  { %1409 = vpow2.f32 %v534_v22 }
 0x428   :  { %v540_v30 = vmul.f32 1.442695, %v525_v28  ;;  %v538_v31 = vmul.f32 1.442695, %v524_v29 }
 0x429   :  { %v1400_v32 = vpop.eup %1399 }
 0x42a   :  { %1411 = vpow2.f32 %v540_v30  ;;  %v545_v33 = vsel %vm193_vm1, %v1400_v32, 0.0 }
 0x42b   :  { %v1402_v34 = vpop.eup %1401  ;;  %1413 = vpow2.f32 %v538_v31  ;;  %546 = vadd.xlane.f32.xlu1 %v545_v33 }
 0x42c   :  { %v542_v35 = vsel %vm193_vm1, %v1402_v34, 0.0 }
 0x42d   :  { %543 = vadd.xlane.f32.xlu0 %v542_v35 }
 0x42f   :  { %v1404_v36 = vpop.eup %1403 }
 0x430   :  { %v1406_v37 = vpop.eup %1405  ;;  %v551_v38 = vsel %vm193_vm1, %v1404_v36, 0.0 }
 0x431   :  { %552 = vadd.xlane.f32.xlu1 %v551_v38  ;;  %v548_v39 = vsel %vm193_vm1, %v1406_v37, 0.0 }
 0x432   :  { %549 = vadd.xlane.f32.xlu0 %v548_v39 }
 0x433   :  { %v1408_v40 = vpop.eup %1407 }
 0x434   :  { %v1410_v41 = vpop.eup %1409  ;;  %v557_v42 = vsel %vm193_vm1, %v1408_v40, 0.0 }
 0x435   :  { %558 = vadd.xlane.f32.xlu1 %v557_v42  ;;  %v554_v44 = vsel %vm193_vm1, %v1410_v41, 0.0 }
 0x436   :  { %555 = vadd.xlane.f32.xlu0 %v554_v44 }
 0x437   :  { %v1412_v46 = vpop.eup %1411 }
 0x438   :  { %v1414_v47 = vpop.eup %1413  ;;  %v563_v48 = vsel %vm193_vm1, %v1412_v46, 0.0 }
 0x439   :  { %564 = vadd.xlane.f32.xlu1 %v563_v48  ;;  %v560_v49 = vsel %vm193_vm1, %v1414_v47, 0.0 }
 0x43a   :  { %561 = vadd.xlane.f32.xlu0 %v560_v49 }
 0x44a   :  { %582 = vrot.lane.b32.xlu1 %v1587_v45, %s1462_s1 }
 0x450   :  { %584 = vrot.lane.b32.xlu0 %v1585_v43, %s1462_s1 }
 0x4b4   :  { %v547_v50 = vpop.xlane.xlu1 %546 }
 0x4b6   :  { %v544_v51 = vpop.xlane.xlu0 %543 }
 0x4b7   :  { %1415 = vrcp.f32 %v544_v51 }
 0x4b8   :  { %1417 = vrcp.f32 %v547_v50 }
 0x4ba   :  { %v553_v52 = vpop.xlane.xlu1 %552 }
 0x4bb   :  { %v550_v53 = vpop.xlane.xlu0 %549 }
 0x4bc   :  { %1419 = vrcp.f32 %v550_v53 }
 0x4bd   :  { %1421 = vrcp.f32 %v553_v52 }
 0x4be   :  { %v559_v54 = vpop.xlane.xlu1 %558 }
 0x4bf   :  { %v556_v56 = vpop.xlane.xlu0 %555 }
 0x4c0   :  { %1423 = vrcp.f32 %v556_v56 }
 0x4c1   :  { %1425 = vrcp.f32 %v559_v54 }
 0x4c2   :  { %v565_v58 = vpop.xlane.xlu1 %564 }
 0x4c3   :  { %v562_v59 = vpop.xlane.xlu0 %561 }
 0x4c4   :  { %v1416_v60 = vpop.eup %1415  ;;  %1427 = vrcp.f32 %v562_v59 }
 0x4c5   :  { %v574_v61 = vmul.f32 %v1416_v60, %v1402_v34  ;;  %1429 = vrcp.f32 %v565_v58  ;;  %v1418_v45 = vpop.eup %1417  ;;  %v941_v60 = vld [vmem:[%s1844_s9 + $0x18] sm:$0xff] }
 0x4c6   :  { %v583_v3 = vpop.permute.xlu1 %582  ;;  %v575_v5 = vmul.f32 %v1418_v45, %v1400_v32  ;;  %v939_v45 = vld [vmem:[%s1844_s9 + $0x8] sm:$0xff] }
 0x4c7   :  { %v585_v43 = vpop.permute.xlu0 %584  ;;  %1314 = vmatprep.mubr.msk.f32.mxu1 %vm193_vm1, %v574_v61  ;;  %v940_v61 = vld [vmem:[%s1844_s9 + $0x10] sm:$0xff] }
 0x4c8   :  { %1310 = vmatprep.subr.mxu1 %v585_v43 }
 0x4c9   :  { %v1420_v62 = vpop.eup %1419  ;;  %1311 = vmatpush3.msra.mxu1 %v585_v43  ;;  %v938_v43 = vld [vmem:[%s1844_s9] sm:$0xff] }
 0x4ca   :  { %1312 = vmatprep.subr.mxu1 %v583_v3  ;;  %v576_v6 = vmul.f32 %v1420_v62, %v1406_v37  ;;  %v1422_v7 = vpop.eup %1421 }
 0x4cb   :  { %1313 = vmatpush3.msra.mxu1 %v583_v3  ;;  %v577_v10 = vmul.f32 %v1422_v7, %v1404_v36 }
 0x4cc   :  { %1315 = vmatmul.mubr.msk.f32.vlgmr.msra.gmra.mxu1 %vm193_vm1, %v575_v5  ;;  %1345 = vmatprep.subr.mxu1 %v812_v21 }
 0x4cd   :  { %v1424_v8 = vpop.eup %1423  ;;  %1317 = vmatprep.mubr.msk.f32.mxu1 %vm193_vm1, %v576_v6  ;;  %1346 = vmatpush3.msra.mxu1 %v812_v21 }
 0x4ce   :  { %v578_v12 = vmul.f32 %v1424_v8, %v1410_v41  ;;  %v1426_v13 = vpop.eup %1425  ;;  %1347 = vmatprep.subr.mxu1 %v811_v23 }
 0x4cf   :  { %v579_v16 = vmul.f32 %v1426_v13, %v1408_v40  ;;  %1348 = vmatpush3.msra.mxu1 %v811_v23 }
 0x4d0   :  { %1318 = vmatmul.mubr.msk.f32.gmra.mxu1 %vm193_vm1, %v577_v10  ;;  %v928_v10 = vsub.s32 2, %v1561_v25 }
 0x4d1   :  { %v1428_v15 = vpop.eup %1427  ;;  %1320 = vmatprep.mubr.msk.f32.mxu1 %vm193_vm1, %v578_v12 }
 0x4d2   :  { %v580_v17 = vmul.f32 %v1428_v15, %v1414_v47  ;;  %v1430_v18 = vpop.eup %1429  ;;  %v929_v13 = vrot.slane %v1567_v27, %v928_v10  ;;  %v934_v15 = vsub.s32 3, %v1561_v25 }
 0x4d3   :  { %v581_v19 = vmul.f32 %v1430_v18, %v1412_v46 }
 0x4d4   :  { %1321 = vmatmul.mubr.msk.f32.gmra.mxu1 %vm193_vm1, %v579_v16  ;;  %v935_v20 = vrot.slane %v1567_v27, %v934_v15 }
 0x4d5   :  { %1323 = vmatprep.mubr.msk.f32.mxu1 %vm193_vm1, %v580_v17 }
 0x4d8   :  { %1324 = vmatmul.mubr.msk.f32.gmra.mxu1 %vm193_vm1, %v581_v19 }
 0x58c   :  { %v1316_v22 = vpop.f32.mrf.mxu1 }
 0x58e   :  { %v678_v24 = vpop.f32.mrf.mxu1 }
 0x590   :  { %v1319_v26 = vpop.f32.mrf.mxu1 }
 0x591   :  { %v720_v37 = vmul.f32 %v1319_v26, %v1652_v4  ;;  %v1054_v26 = vld [vmem:[%s1846_s11 + $0x30] sm:$0xff] }
 0x592   :  { %v688_v28 = vpop.f32.mrf.mxu1 }
 0x593   :  { %v719_v38 = vmul.f32 %v688_v28, %v1642_v63  ;;  %v810_v63 = vld [vmem:[%s1842_s7 + $0x8] sm:$0xff] }
 0x594   :  { %v1322_v29 = vpop.f32.mrf.mxu1  ;;  %1349 = vmatprep.subr.mxu1 %v810_v63  ;;  %v1053_v28 = vld [vmem:[%s1846_s11 + $0x28] sm:$0xff] }
 0x595   :  { %v722_v35 = vmul.f32 %v1322_v29, %v1667_v11  ;;  %v717_v11 = vmul.f32 %v678_v24, %v1630_v55  ;;  %1350 = vmatpush3.msra.mxu1 %v810_v63  ;;  %v809_v55 = vld [vmem:[%s1842_s7] sm:$0xff]  ;;  %v1055_v24 = vld [vmem:[%s1846_s11 + $0x38] sm:$0xff] }
 0x596   :  { %v698_v30 = vpop.f32.mrf.mxu1  ;;  %1351 = vmatprep.subr.mxu1 %v809_v55  ;;  %v1052_v29 = vld [vmem:[%s1846_s11 + $0x20] sm:$0xff] }
 0x597   :  { %v721_v36 = vmul.f32 %v698_v30, %v1647_v2  ;;  %v726_v2 = vld [vmem:[%s1839_s4 + $0x8] sm:$0xff]  ;;  %1352 = vmatpush3.msra.mxu1 %v809_v55  ;;  %v1051_v30 = vld [vmem:[%s1846_s11 + $0x18] sm:$0xff] }
 0x598   :  { %v1325_v31 = vpop.f32.mrf.mxu1  ;;  %1367 = vmatprep.subr.mxu1 %v1055_v24 }
 0x599   :  { %v724_v32 = vmul.f32 %v1325_v31, %v1677_v14  ;;  %v815_v14 = vsub.s32 4, %v1561_v25  ;;  %v1050_v31 = vld [vmem:[%s1846_s11 + $0x10] sm:$0xff] }
 0x59a   :  { %v708_v33 = vpop.f32.mrf.mxu1 }
 0x59b   :  { %v723_v34 = vmul.f32 %v708_v33, %v1662_v9  ;;  %1326 = vmatprep.subr.mxu0 %v724_v32  ;;  %v718_v9 = vmul.f32 %v1316_v22, %v1635_v57  ;;  %v816_v39 = vrot.slane %v1567_v27, %v815_v14  ;;  %v1048_v33 = vld [vmem:[%s1846_s11] sm:$0xff] }
 0x59c   :  { %1327 = vmatpush3.msra.mxu0 %v724_v32  ;;  %v1049_v32 = vld [vmem:[%s1846_s11 + $0x8] sm:$0xff] }
 0x59d   :  { %1328 = vmatprep.subr.mxu0 %v723_v34 }
 0x59e   :  { %1329 = vmatpush3.msra.mxu0 %v723_v34  ;;  %v1194_v34 = vld [vmem:[%s1845_s10] ss:$0 sm:$0xff]  ;;  %s1463_s10 = smov [#allocation2]  }
 0x59f   :  { %1330 = vmatprep.subr.mxu0 %v722_v35  ;;  %s1150_s11 = sshll.u32 %s1463_s10, 4  ;;  %s1151_s11 = int_to_ptr.vmem [resolvable:$true] %s1150_s11 }
 0x5a0   :  { %1331 = vmatpush3.msra.mxu0 %v722_v35  ;;  %s1439_s26 = scalar_lea.vmem %s1151_s11, 256  ;;  %p1444_p1 = scmp.lt.s32.totalorder %s1151_s11, %s1151_s11 }
 0x5a1   :  { %1332 = vmatprep.subr.mxu0 %v721_v36  ;;  %p1440_p0 = scmp.ne.s32.totalorder %s1151_s11, %s1439_s26  ;;  %p1445_p2 = scmp.lt.s32.totalorder %s1439_s26, %s1439_s26 }
 0x5a2   :  { %1333 = vmatpush3.msra.mxu0 %v721_v36 }
 0x5a3   :  { %1334 = vmatprep.subr.mxu0 %v720_v37  ;;  %p1446_p3 = por %p1445_p2, %p1444_p1 }
 0x5a4   :  { %1335 = vmatpush3.msra.mxu0 %v720_v37 }
 0x5a5   :  { %1336 = vmatprep.subr.mxu0 %v719_v38  ;;  %p1447_p4 = pnand %p1446_p3, %p1440_p0 }
 0x5a6   :  { %1337 = vmatpush3.msra.mxu0 %v719_v38 }
 0x5a7   :  { %1338 = vmatprep.subr.mxu0 %v718_v9 }
 0x5a8   :  { %1339 = vmatpush3.msra.mxu0 %v718_v9 }
 0x5a9   :  { %1340 = vmatprep.subr.mxu0 %v717_v11 }
 0x5aa   :  { %1341 = vmatpush3.msra.mxu0 %v717_v11 }
 0x5ab   :  { %1343 = vmatmul.mubr.msk.f32.vlgmr.msra.gmra.mxu0 %vm727_vm2, %v726_v2  ;;  %1356 = vmatprep.subr.mxu0 %v941_v60 }
 0x5ac   :  { %1357 = vmatpush3.msra.mxu0 %v941_v60 }
 0x5ad   :  { %1358 = vmatprep.subr.mxu0 %v940_v61 }
 0x5ae   :  { %1359 = vmatpush3.msra.mxu0 %v940_v61 }
 0x5af   :  { %1360 = vmatprep.subr.mxu0 %v939_v45 }
 0x5b0   :  { %1361 = vmatpush3.msra.mxu0 %v939_v45 }
 0x5b1   :  { %1362 = vmatprep.subr.mxu0 %v938_v43 }
 0x5b2   :  { %1363 = vmatpush3.msra.mxu0 %v938_v43 }
 0x66b   :  { %v1344_v57 = vpop.f32.mrf.mxu0 }
 0x66d   :  { %v800_v4 = vpop.f32.mrf.mxu0 }
 0x66e   :  { %1353 = vmatprep.mubr.msk.f32.mxu1 %vm45_vm0, %v800_v4 }
 0x66f   :  { %1354 = vmatmul.mubr.msk.f32.vlgmr.msra.gmra.mxu1 %vm45_vm0, %v1344_v57 }
 0x670   :  { %1368 = vmatpush3.msra.mxu1 %v1055_v24 }
 0x671   :  { %1369 = vmatprep.subr.mxu1 %v1054_v26 }
 0x672   :  { %1370 = vmatpush3.msra.mxu1 %v1054_v26 }
 0x673   :  { %1371 = vmatprep.subr.mxu1 %v1053_v28 }
 0x674   :  { %1372 = vmatpush3.msra.mxu1 %v1053_v28 }
 0x675   :  { %1373 = vmatprep.subr.mxu1 %v1052_v29 }
 0x676   :  { %1374 = vmatpush3.msra.mxu1 %v1052_v29 }
 0x677   :  { %1375 = vmatprep.subr.mxu1 %v1051_v30 }
 0x678   :  { %1376 = vmatpush3.msra.mxu1 %v1051_v30 }
 0x679   :  { %1377 = vmatprep.subr.mxu1 %v1050_v31 }
 0x67a   :  { %1378 = vmatpush3.msra.mxu1 %v1050_v31 }
 0x67b   :  { %1379 = vmatprep.subr.mxu1 %v1049_v32 }
 0x67c   :  { %1380 = vmatpush3.msra.mxu1 %v1049_v32 }
 0x67d   :  { %1381 = vmatprep.subr.mxu1 %v1048_v33 }
 0x67e   :  { %1382 = vmatpush3.msra.mxu1 %v1048_v33 }
 0x72f   :  { %v1355_v40 = vpop.f32.mrf.mxu1 }
 0x730   :  { %v895_v41 = vadd.f32 %v1355_v40, %v816_v39 }
 0x731   :  { %v889_v42 = vpop.f32.mrf.mxu1 }
 0x732   :  { %v1766_v44 = vadd.f32 %v895_v41, %v1539_v1  ;;  %v890_v46 = vadd.f32 %v889_v42, %v816_v39 }
 0x734   :  { %v1769_v47 = vadd.f32 %v890_v46, %v1534_v0  ;;  %v903_v48 = vsel %vm45_vm0, %v1766_v44, 0.0 }
 0x735   :  { %904 = vadd.xlane.f32.xlu0 %v903_v48 }
 0x736   :  { %v900_v49 = vsel %vm45_vm0, %v1769_v47, 0.0 }
 0x737   :  { %901 = vadd.xlane.f32.xlu1 %v900_v49 }
 0x7be   :  { %v905_v50 = vpop.xlane.xlu0 %904 }
 0x7bf   :  { %v907_v51 = vmul.f32 0.03125, %v905_v50 }
 0x7c0   :  { %v902_v52 = vpop.xlane.xlu1 %901 }
 0x7c1   :  { %v909_v53 = vsub.f32 %v1766_v44, %v907_v51  ;;  %v906_v54 = vmul.f32 0.03125, %v902_v52 }
 0x7c3   :  { %v908_v1 = vsub.f32 %v1769_v47, %v906_v54  ;;  %v911_v56 = vmul.f32 %v909_v53, %v909_v53 }
 0x7c5   :  { %v915_v0 = vsel %vm45_vm0, %v911_v56, 0.0  ;;  %v910_v58 = vmul.f32 %v908_v1, %v908_v1 }
 0x7c6   :  { %916 = vadd.xlane.f32.xlu1 %v915_v0 }
 0x7c7   :  { %v912_v59 = vsel %vm45_vm0, %v910_v58, 0.0 }
 0x7c8   :  { %913 = vadd.xlane.f32.xlu0 %v912_v59 }
 0x84f   :  { %v917_v62 = vpop.xlane.xlu1 %916 }
 0x850   :  { %v919_v3 = vmul.f32 0.03125, %v917_v62 }
 0x851   :  { %v914_v5 = vpop.xlane.xlu0 %913 }
 0x852   :  { %v921_v6 = vadd.f32 1e-06, %v919_v3  ;;  %v918_v7 = vmul.f32 0.03125, %v914_v5 }
 0x854   :  { %1431 = vrsqrt.f32 %v921_v6  ;;  %v920_v8 = vadd.f32 1e-06, %v918_v7 }
 0x856   :  { %1433 = vrsqrt.f32 %v920_v8 }
 0x861   :  { %v1432_v12 = vpop.eup %1431 }
 0x862   :  { %v925_v16 = vmul.f32 %v1432_v12, %v909_v53  ;;  %v1058_v53 = vsub.s32 5, %v1561_v25 }
 0x863   :  { %v1434_v17 = vpop.eup %1433 }
 0x864   :  { %v924_v18 = vmul.f32 %v1434_v17, %v908_v1  ;;  %v931_v19 = vmul.f32 %v929_v13, %v925_v16  ;;  %v1059_v54 = vrot.slane %v1567_v27, %v1058_v53 }
 0x866   :  { %v930_v21 = vmul.f32 %v929_v13, %v924_v18  ;;  %v937_v22 = vadd.f32 %v935_v20, %v931_v19 }
 0x868   :  { %v936_v23 = vadd.f32 %v935_v20, %v930_v21 }
 0x86a   :  { %1364 = vmatprep.mubr.msk.f32.mxu0 %vm45_vm0, %v936_v23 }
 0x86b   :  { %1365 = vmatmul.mubr.msk.f32.vlgmr.msra.gmra.mxu0 %vm45_vm0, %v937_v22 }
 0x92b   :  { %v1366_v35 = vpop.f32.mrf.mxu0 }
 0x92c   :  { %v1027_v36 = vadd.f32 %v1366_v35, %v1194_v34 }
 0x92d   :  { %v1021_v37 = vpop.f32.mrf.mxu0 }
 0x92e   :  { %v1031_v38 = vmul.f32 %v1027_v36, %v1027_v36  ;;  %v1022_v9 = vadd.f32 %v1194_v34, %v1021_v37 }
 0x930   :  { %v1033_v11 = vmul.f32 %v1031_v38, %v1027_v36  ;;  %v1030_v2 = vmul.f32 %v1022_v9, %v1022_v9 }
 0x932   :  { %v1035_v63 = vmul.f32 0.044715, %v1033_v11  ;;  %v1032_v55 = vmul.f32 %v1030_v2, %v1022_v9 }
 0x934   :  { %v1037_v57 = vadd.f32 %v1035_v63, %v1027_v36  ;;  %v1034_v4 = vmul.f32 0.044715, %v1032_v55 }
 0x936   :  { %v1039_v14 = vmul.f32 0.7978846, %v1037_v57  ;;  %v1036_v39 = vadd.f32 %v1034_v4, %v1022_v9 }
 0x938   :  { %1435 = vtanh.f32 %v1039_v14  ;;  %v1038_v40 = vmul.f32 0.7978846, %v1036_v39 }
 0x93a   :  { %1437 = vtanh.f32 %v1038_v40 }
 0x945   :  { %v1436_v41 = vpop.eup %1435 }
 0x946   :  { %v1043_v42 = vadd.f32 1.0, %v1436_v41 }
 0x947   :  { %v1438_v46 = vpop.eup %1437 }
 0x948   :  { %v1042_v48 = vadd.f32 1.0, %v1438_v46  ;;  %v1045_v49 = vmul.f32 0.5, %v1043_v42 }
 0x94a   :  { %v1044_v50 = vmul.f32 0.5, %v1042_v48  ;;  %v1047_v52 = vmul.f32 %v1045_v49, %v1027_v36 }
 0x94c   :  { %v1046_v51 = vmul.f32 %v1044_v50, %v1022_v9 }
 0x94e   :  { %1383 = vmatprep.mubr.msk.f32.mxu1 %vm727_vm2, %v1046_v51 }
 0x94f   :  { %1384 = vmatmul.mubr.msk.f32.vlgmr.msra.gmra.mxu1 %vm727_vm2, %v1047_v52 }
 0xa0f   :  { %v1385_v1 = vpop.f32.mrf.mxu1 }
 0xa10   :  { %v1138_v56 = vadd.f32 %v1385_v1, %v1059_v54 }
 0xa11   :  { %v1132_v0 = vpop.f32.mrf.mxu1 }
 0xa12   :  { %v1142_v58 = vadd.f32 %v1138_v56, %v1766_v44  ;;  %v1133_v59 = vadd.f32 %v1132_v0, %v1059_v54 }
 0xa14   :  { %1144 = vst.msk [vmem:[#allocation2 + $0x8] sm:$0xff] %vm45_vm0, %v1142_v58  ;;  %v1141_v60 = vadd.f32 %v1133_v59, %v1769_v47 }
 0xa16   :  { %1143 = vst.msk [vmem:[#allocation2] sm:$0xff] %vm45_vm0, %v1141_v60 }
 0xa17   :  { %1450 = shalt.err (!%p1447_p4)
}
 0xa18   :  { %s1464_s27 = smov 128   ;;  %s1465_s4 = smov 8  }
 0xa19   :  { %1156 = dma.vmem_to_hbm [thread:$0]  %s1151_s11, 256, %s1847_s12, [#allocation3], %s1464_s27, %s1464_s27, %s1465_s4  }
 0xa1a   :  { %1459 = dma.done.wait [#allocation3], 256  }
 0xa1b   :  { %1460 = vsyncadd [#allocation3], 4294967040 }
 0xa1c   :  { %1160 = vsyncpa [#allocation3], 1 }

</bundles_post_ra>
